<compile_context>
chip_gen: v6e
topology: v6e:2x2x1
jax: 0.10.0
libtpu: 0.0.40
codegen_flags: <defaults>
</compile_context>

<pallas_src>
import functools

import jax
import jax.numpy as jnp
from jax.experimental import pallas as pl
from jax.experimental.pallas import tpu as pltpu

LN_EPS = 1e-5          # torch.nn.LayerNorm default eps
MASK_FILL = -1e9       # masked_fill_ value in the reference module


def _attention_kernel(x_ref, maskrow_ref, con_ref, ln_g_ref, ln_b_ref,
                      wq_ref, wk_ref, wv_ref, wout_ref,
                      out_ref, attn_ref,
                      q_scr, k_scr, v_scr,
                      *, heads, q_tile, scale):
    qi = pl.program_id(1)

    # ---- once per batch: LayerNorm + QKV projection into persistent VMEM scratch ----
    @pl.when(qi == 0)
    def _():
        x = x_ref[0].astype(jnp.float32)                       # [N, D]
        mu = jnp.mean(x, axis=-1, keepdims=True)
        var = jnp.mean((x - mu) ** 2, axis=-1, keepdims=True)  # biased var (torch LN)
        xn = (x - mu) * jax.lax.rsqrt(var + LN_EPS)
        xn = xn * ln_g_ref[0] + ln_b_ref[0]
        # broadcast over heads so q/k/v land directly in [H, N, dh] layout via
        # leading-batch batched matmuls (no in-kernel transposes / lane reshapes).
        xn_b = jnp.broadcast_to(xn.astype(jnp.bfloat16)[None], (heads,) + xn.shape)
        q_scr[...] = jnp.einsum('hnd,hdk->hnk', xn_b, wq_ref[...],
                                preferred_element_type=jnp.float32).astype(q_scr.dtype)
        k_scr[...] = jnp.einsum('hnd,hdk->hnk', xn_b, wk_ref[...],
                                preferred_element_type=jnp.float32).astype(k_scr.dtype)
        v_scr[...] = jnp.einsum('hnd,hdk->hnk', xn_b, wv_ref[...],
                                preferred_element_type=jnp.float32).astype(v_scr.dtype)

    # ---- per query tile ----
    start = pl.multiple_of(qi * q_tile, q_tile)
    q = q_scr[:, pl.ds(start, q_tile), :]                       # [H, Tq, dh] bf16

    # QK^T for all heads: leading-batch batched matmul, f32 accumulation.
    raw = jnp.einsum('hqd,hkd->hqk', q, k_scr[...],
                     preferred_element_type=jnp.float32)        # [H, Tq, N] f32

    # Exactly match the reference ordering:
    #   dots = matmul*scale ; masked_fill(-1e9) ; dots = dots + con*dots
    pad = maskrow_ref[0] > 0.5                                  # [1, N] key-axis pad mask
    dots = jnp.where(pad, jnp.float32(MASK_FILL), raw * scale)
    dots = dots * (1.0 + con_ref[0])                            # con broadcast over heads

    # ---- softmax over keys (f32 statistics) ----
    m = jnp.max(dots, axis=-1, keepdims=True)
    e = jnp.exp(dots - m)
    attn = e * pl.reciprocal(jnp.sum(e, axis=-1, keepdims=True), approx=True)

    attn_ref[0] = attn.astype(attn_ref.dtype)                   # [H, Tq, N] batched store

    # attn @ v, then head-merge fused into the out projection (no transpose):
    out_h = jnp.einsum('hqk,hkd->hqd', attn.astype(jnp.bfloat16), v_scr[...],
                       preferred_element_type=jnp.float32)      # [H, Tq, dh]
    proj = jnp.einsum('hqd,hde->hqe', out_h.astype(jnp.bfloat16), wout_ref[...],
                      preferred_element_type=jnp.float32)       # [H, Tq, D]
    # TODO(synk): nn.Dropout(0.1) is a no-op in eval mode; implemented as identity.
    out_ref[0] = jnp.sum(proj, axis=0).astype(out_ref.dtype)    # [Tq, D]


def attention_forward(x, labels, con, params, *, heads, dim_head):
    """Mirrors Attention.forward: returns (to_out(attn@v), attn)."""
    B, N, D = x.shape
    inner = heads * dim_head
    scale = float(dim_head) ** (-0.5)

    # Flash-style query tiling; fall back to a single tile when N is small/odd.
    q_tile = 128 if (N % 128 == 0) else N
    num_q_tiles = N // q_tile

    # get_attn_pad_mask needs only the per-key row: (labels == 0) -> [B, 1, N].
    if labels is not None:
        mask_row = (labels == 0).astype(jnp.float32)[:, None, :]
    else:
        mask_row = jnp.zeros((B, 1, N), jnp.float32)

    # Pre-permuted, per-head, bf16 weights (layout plumbing done once in XLA).
    w_qkv = params["w_qkv"]
    w_q = w_qkv[:, 0 * inner:1 * inner].reshape(D, heads, dim_head).transpose(1, 0, 2)
    w_k = w_qkv[:, 1 * inner:2 * inner].reshape(D, heads, dim_head).transpose(1, 0, 2)
    w_v = w_qkv[:, 2 * inner:3 * inner].reshape(D, heads, dim_head).transpose(1, 0, 2)
    w_o = params["w_out"].reshape(heads, dim_head, D)
    w_q, w_k, w_v, w_o = (t.astype(jnp.bfloat16) for t in (w_q, w_k, w_v, w_o))

    # VMEM budget: double-buffered BlockSpec blocks + persistent scratch + kernel temps,
    # capped at 48 MiB (v7x has only 64 MiB per TensorCore; leave compiler headroom).
    bf32, bbf16 = 4, 2
    blocks = 2 * (N * D * bf32 + N * bf32 + q_tile * N * bf32
                  + q_tile * D * bf32 + heads * q_tile * N * bf32)
    weights = 2 * (3 * heads * D * dim_head * bbf16
                   + heads * dim_head * D * bbf16 + 2 * D * bf32)
    scratch = 3 * heads * N * dim_head * bbf16
    temps = 6 * heads * q_tile * N * bf32 + 2 * heads * N * D * bf32
    vmem_limit = int(min(48 * 1024 * 1024,
                         max(16 * 1024 * 1024,
                             blocks + weights + scratch + temps + (4 << 20))))

    kernel = functools.partial(_attention_kernel,
                               heads=heads, q_tile=q_tile, scale=scale)

    out, attn = pl.pallas_call(
        kernel,
        grid=(B, num_q_tiles),
        in_specs=[
            pl.BlockSpec((1, N, D), lambda b, q: (b, 0, 0)),             # x (full seq / batch)
            pl.BlockSpec((1, 1, N), lambda b, q: (b, 0, 0)),             # pad-mask key row
            pl.BlockSpec((1, q_tile, N), lambda b, q: (b, q, 0)),        # con rows of this tile
            pl.BlockSpec((1, D), lambda b, q: (0, 0)),                   # LN gamma
            pl.BlockSpec((1, D), lambda b, q: (0, 0)),                   # LN beta
            pl.BlockSpec((heads, D, dim_head), lambda b, q: (0, 0, 0)),  # W_q per head
            pl.BlockSpec((heads, D, dim_head), lambda b, q: (0, 0, 0)),  # W_k per head
            pl.BlockSpec((heads, D, dim_head), lambda b, q: (0, 0, 0)),  # W_v per head
            pl.BlockSpec((heads, dim_head, D), lambda b, q: (0, 0, 0)),  # W_out per head
        ],
        out_specs=[
            pl.BlockSpec((1, q_tile, D), lambda b, q: (b, q, 0)),            # out
            pl.BlockSpec((1, heads, q_tile, N), lambda b, q: (b, 0, q, 0)),  # attn maps
        ],
        out_shape=[
            jax.ShapeDtypeStruct((B, N, D), jnp.float32),
            jax.ShapeDtypeStruct((B, heads, N, N), jnp.float32),
        ],
        scratch_shapes=[
            pltpu.VMEM((heads, N, dim_head), jnp.bfloat16),   # Q (whole batch, persistent)
            pltpu.VMEM((heads, N, dim_head), jnp.bfloat16),   # K
            pltpu.VMEM((heads, N, dim_head), jnp.bfloat16),   # V
        ],
        compiler_params=pltpu.CompilerParams(
            dimension_semantics=("parallel", "arbitrary"),
            vmem_limit_bytes=vmem_limit),
    )(x, mask_row, con, params["ln_g"], params["ln_b"], w_q, w_k, w_v, w_o)
    return out, attn


def reference_attention(x, labels, con, p, *, heads, dim_head):
    """Pure-JAX f32 reference mirroring the PyTorch module (eval mode)."""
    B, N, D = x.shape
    inner = heads * dim_head
    scale = float(dim_head) ** (-0.5)

    mu = x.mean(-1, keepdims=True)
    var = ((x - mu) ** 2).mean(-1, keepdims=True)
    xn = (x - mu) / jnp.sqrt(var + LN_EPS) * p["ln_g"][0] + p["ln_b"][0]

    qkv = xn @ p["w_qkv"]
    q, k, v = jnp.split(qkv, 3, axis=-1)
    rs = lambda t: t.reshape(B, N, heads, dim_head).transpose(0, 2, 1, 3)
    q, k, v = rs(q), rs(k), rs(v)

    dots = jnp.einsum('bhnd,bhmd->bhnm', q, k) * scale
    if labels is not None:
        maskf = (labels == 0)[:, None, None, :]
        dots = jnp.where(maskf, MASK_FILL, dots)
    dots = dots + con[:, None] * dots
    attn = jax.nn.softmax(dots, axis=-1)

    out = jnp.einsum('bhnm,bhmd->bhnd', attn, v).transpose(0, 2, 1, 3).reshape(B, N, inner)
    return out @ p["w_out"], attn


def init_params(key, dim, heads, dim_head):
    inner = heads * dim_head
    ks = jax.random.split(key, 4)
    return dict(
        ln_g=1.0 + 0.1 * jax.random.normal(ks[0], (1, dim), jnp.float32),
        ln_b=0.1 * jax.random.normal(ks[1], (1, dim), jnp.float32),
        w_qkv=0.02 * jax.random.normal(ks[2], (dim, 3 * inner), jnp.float32),
        w_out=0.02 * jax.random.normal(ks[3], (inner, dim), jnp.float32),
    )


if __name__ == "__main__":
    B, N = 2, 8
    dim, heads, dim_head = 32, 4, 8

    key = jax.random.PRNGKey(0)
    kx, kl, kc, kp = jax.random.split(key, 4)

    x = jax.random.normal(kx, (B, N, dim), jnp.float32)
    labels = jax.random.randint(kl, (B, N), 0, 3)          # zeros -> pad positions
    con = 0.1 * jax.random.uniform(kc, (B, N, N), jnp.float32)
    params = init_params(kp, dim, heads, dim_head)

    out, attn = attention_forward(x, labels, con, params, heads=heads, dim_head=dim_head)
    out = jax.block_until_ready(out)
    attn = jax.block_until_ready(attn)

    out_ref, attn_ref = reference_attention(x, labels, con, params,
                                            heads=heads, dim_head=dim_head)
    assert jnp.allclose(out, out_ref, rtol=1e-3, atol=1e-3), "out mismatch"
    assert jnp.allclose(attn, attn_ref, rtol=1e-3, atol=1e-3), "attn mismatch"

    print("KERNEL_OK")
</pallas_src>

<mosaic_0001>
module attributes {stable_mosaic.version = 11 : i64} {
  func.func @_attention_kernel(%arg0: i32, %arg1: i32, %arg2: memref<1x8x32xf32, #tpu.memory_space<vmem>>, %arg3: memref<1x1x8xf32, #tpu.memory_space<vmem>>, %arg4: memref<1x8x8xf32, #tpu.memory_space<vmem>>, %arg5: memref<1x32xf32, #tpu.memory_space<vmem>>, %arg6: memref<1x32xf32, #tpu.memory_space<vmem>>, %arg7: memref<4x32x8xbf16, #tpu.memory_space<vmem>>, %arg8: memref<4x32x8xbf16, #tpu.memory_space<vmem>>, %arg9: memref<4x32x8xbf16, #tpu.memory_space<vmem>>, %arg10: memref<4x8x32xbf16, #tpu.memory_space<vmem>>, %arg11: memref<1x8x32xf32, #tpu.memory_space<vmem>>, %arg12: memref<1x4x8x8xf32, #tpu.memory_space<vmem>>, %arg13: memref<4x8x8xbf16, #tpu.memory_space<vmem>>, %arg14: memref<4x8x8xbf16, #tpu.memory_space<vmem>>, %arg15: memref<4x8x8xbf16, #tpu.memory_space<vmem>>) attributes {dimension_semantics = [#tpu.dimension_semantics<parallel>, #tpu.dimension_semantics<arbitrary>], iteration_bounds = array<i64: 2, 1>, scalar_prefetch = 0 : i64, scratch_operands = 3 : i64, tpu.core_type = #tpu.core_type<tc>, window_params = [{transform_indices = @transform_0, window_bounds = array<i64: 1, 8, 32>}, {transform_indices = @transform_1, window_bounds = array<i64: 1, 1, 8>}, {transform_indices = @transform_2, window_bounds = array<i64: 1, 8, 8>}, {pipeline_mode = #tpu.pipeline_mode<synchronous>, transform_indices = @transform_3, window_bounds = array<i64: 1, 32>}, {pipeline_mode = #tpu.pipeline_mode<synchronous>, transform_indices = @transform_4, window_bounds = array<i64: 1, 32>}, {pipeline_mode = #tpu.pipeline_mode<synchronous>, transform_indices = @transform_5, window_bounds = array<i64: 4, 32, 8>}, {pipeline_mode = #tpu.pipeline_mode<synchronous>, transform_indices = @transform_6, window_bounds = array<i64: 4, 32, 8>}, {pipeline_mode = #tpu.pipeline_mode<synchronous>, transform_indices = @transform_7, window_bounds = array<i64: 4, 32, 8>}, {pipeline_mode = #tpu.pipeline_mode<synchronous>, transform_indices = @transform_8, window_bounds = array<i64: 4, 8, 32>}, {transform_indices = @transform_9, window_bounds = array<i64: 1, 8, 32>}, {transform_indices = @transform_10, window_bounds = array<i64: 1, 4, 8, 8>}]} {
    %c0_i32 = arith.constant 0 : i32
    %0 = arith.cmpi eq, %arg1, %c0_i32 : i32
    %1 = arith.extui %0 : i1 to i32
    %c0_i32_0 = arith.constant 0 : i32
    %2 = arith.cmpi ne, %1, %c0_i32_0 : i32
    scf.if %2 {
      %c0_33 = arith.constant 0 : index
      %c0_34 = arith.constant 0 : index
      %c0_35 = arith.constant 0 : index
      %49 = vector.load %arg2[%c0_33, %c0_34, %c0_35] : memref<1x8x32xf32, #tpu.memory_space<vmem>>, vector<1x8x32xf32>
      %50 = vector.shape_cast %49 : vector<1x8x32xf32> to vector<8x32xf32>
      %cst_36 = arith.constant dense<0.000000e+00> : vector<8xf32>
      %51 = vector.multi_reduction <add>, %50, %cst_36 [1] : vector<8x32xf32> to vector<8xf32>
      %52 = vector.shape_cast %51 : vector<8xf32> to vector<8x1xf32>
      %cst_37 = arith.constant 3.200000e+01 : f32
      %53 = vector.broadcast %cst_37 : f32 to vector<8x1xf32>
      %54 = arith.divf %52, %53 : vector<8x1xf32>
      %55 = vector.broadcast %54 : vector<8x1xf32> to vector<8x32xf32>
      %56 = arith.subf %50, %55 : vector<8x32xf32>
      %57 = arith.mulf %56, %56 : vector<8x32xf32>
      %cst_38 = arith.constant dense<0.000000e+00> : vector<8xf32>
      %58 = vector.multi_reduction <add>, %57, %cst_38 [1] : vector<8x32xf32> to vector<8xf32>
      %59 = vector.shape_cast %58 : vector<8xf32> to vector<8x1xf32>
      %cst_39 = arith.constant 3.200000e+01 : f32
      %60 = vector.broadcast %cst_39 : f32 to vector<8x1xf32>
      %61 = arith.divf %59, %60 : vector<8x1xf32>
      %62 = vector.broadcast %54 : vector<8x1xf32> to vector<8x32xf32>
      %63 = arith.subf %50, %62 : vector<8x32xf32>
      %cst_40 = arith.constant 9.99999974E-6 : f32
      %64 = vector.broadcast %cst_40 : f32 to vector<8x1xf32>
      %65 = arith.addf %61, %64 : vector<8x1xf32>
      %66 = math.rsqrt %65 : vector<8x1xf32>
      %67 = vector.broadcast %66 : vector<8x1xf32> to vector<8x32xf32>
      %68 = arith.mulf %63, %67 : vector<8x32xf32>
      %c0_41 = arith.constant 0 : index
      %c0_42 = arith.constant 0 : index
      %69 = vector.load %arg5[%c0_41, %c0_42] : memref<1x32xf32, #tpu.memory_space<vmem>>, vector<1x32xf32>
      %70 = vector.shape_cast %69 : vector<1x32xf32> to vector<32xf32>
      %71 = vector.shape_cast %70 : vector<32xf32> to vector<1x32xf32>
      %72 = vector.broadcast %71 : vector<1x32xf32> to vector<8x32xf32>
      %73 = arith.mulf %68, %72 : vector<8x32xf32>
      %c0_43 = arith.constant 0 : index
      %c0_44 = arith.constant 0 : index
      %74 = vector.load %arg6[%c0_43, %c0_44] : memref<1x32xf32, #tpu.memory_space<vmem>>, vector<1x32xf32>
      %75 = vector.shape_cast %74 : vector<1x32xf32> to vector<32xf32>
      %76 = vector.shape_cast %75 : vector<32xf32> to vector<1x32xf32>
      %77 = vector.broadcast %76 : vector<1x32xf32> to vector<8x32xf32>
      %78 = arith.addf %73, %77 : vector<8x32xf32>
      %79 = arith.truncf %78 : vector<8x32xf32> to vector<8x32xbf16>
      %80 = vector.shape_cast %79 : vector<8x32xbf16> to vector<1x8x32xbf16>
      %81 = vector.shape_cast %80 : vector<1x8x32xbf16> to vector<1x8x32xbf16>
      %82 = vector.broadcast %81 : vector<1x8x32xbf16> to vector<4x8x32xbf16>
      %c0_45 = arith.constant 0 : index
      %c0_46 = arith.constant 0 : index
      %c0_47 = arith.constant 0 : index
      %83 = vector.load %arg7[%c0_45, %c0_46, %c0_47] : memref<4x32x8xbf16, #tpu.memory_space<vmem>>, vector<4x32x8xbf16>
      "tpu.trace_start"() <{level = 10 : i32, message = "hnd,hdk->hnk"}> : () -> ()
      %cst_48 = arith.constant dense<0.000000e+00> : vector<4x8x8xf32>
      %84 = tpu.matmul %82, %83, %cst_48 {dimension_numbers = #tpu.dot_dimension_numbers<[2], [1], [1], [2], [0, 0, 0, 1, 1, 2], [0], [0]>} : vector<4x8x32xbf16>, vector<4x32x8xbf16>, vector<4x8x8xf32> -> vector<4x8x8xf32>
      "tpu.trace_stop"() : () -> ()
      %85 = arith.truncf %84 : vector<4x8x8xf32> to vector<4x8x8xbf16>
      %c0_49 = arith.constant 0 : index
      %c0_50 = arith.constant 0 : index
      %c0_51 = arith.constant 0 : index
      %86 = vector.load %arg13[%c0_49, %c0_50, %c0_51] : memref<4x8x8xbf16, #tpu.memory_space<vmem>>, vector<4x8x8xbf16>
      tpu.vector_store %arg13[%c0_49, %c0_50, %c0_51], %85 {strides = array<i32>} : memref<4x8x8xbf16, #tpu.memory_space<vmem>>, vector<4x8x8xbf16>,
      %c0_52 = arith.constant 0 : index
      %c0_53 = arith.constant 0 : index
      %c0_54 = arith.constant 0 : index
      %87 = vector.load %arg8[%c0_52, %c0_53, %c0_54] : memref<4x32x8xbf16, #tpu.memory_space<vmem>>, vector<4x32x8xbf16>
      "tpu.trace_start"() <{level = 10 : i32, message = "hnd,hdk->hnk"}> : () -> ()
      %cst_55 = arith.constant dense<0.000000e+00> : vector<4x8x8xf32>
      %88 = tpu.matmul %82, %87, %cst_55 {dimension_numbers = #tpu.dot_dimension_numbers<[2], [1], [1], [2], [0, 0, 0, 1, 1, 2], [0], [0]>} : vector<4x8x32xbf16>, vector<4x32x8xbf16>, vector<4x8x8xf32> -> vector<4x8x8xf32>
      "tpu.trace_stop"() : () -> ()
      %89 = arith.truncf %88 : vector<4x8x8xf32> to vector<4x8x8xbf16>
      %c0_56 = arith.constant 0 : index
      %c0_57 = arith.constant 0 : index
      %c0_58 = arith.constant 0 : index
      %90 = vector.load %arg14[%c0_56, %c0_57, %c0_58] : memref<4x8x8xbf16, #tpu.memory_space<vmem>>, vector<4x8x8xbf16>
      tpu.vector_store %arg14[%c0_56, %c0_57, %c0_58], %89 {strides = array<i32>} : memref<4x8x8xbf16, #tpu.memory_space<vmem>>, vector<4x8x8xbf16>,
      %c0_59 = arith.constant 0 : index
      %c0_60 = arith.constant 0 : index
      %c0_61 = arith.constant 0 : index
      %91 = vector.load %arg9[%c0_59, %c0_60, %c0_61] : memref<4x32x8xbf16, #tpu.memory_space<vmem>>, vector<4x32x8xbf16>
      "tpu.trace_start"() <{level = 10 : i32, message = "hnd,hdk->hnk"}> : () -> ()
      %cst_62 = arith.constant dense<0.000000e+00> : vector<4x8x8xf32>
      %92 = tpu.matmul %82, %91, %cst_62 {dimension_numbers = #tpu.dot_dimension_numbers<[2], [1], [1], [2], [0, 0, 0, 1, 1, 2], [0], [0]>} : vector<4x8x32xbf16>, vector<4x32x8xbf16>, vector<4x8x8xf32> -> vector<4x8x8xf32>
      "tpu.trace_stop"() : () -> ()
      %93 = arith.truncf %92 : vector<4x8x8xf32> to vector<4x8x8xbf16>
      %c0_63 = arith.constant 0 : index
      %c0_64 = arith.constant 0 : index
      %c0_65 = arith.constant 0 : index
      %94 = vector.load %arg15[%c0_63, %c0_64, %c0_65] : memref<4x8x8xbf16, #tpu.memory_space<vmem>>, vector<4x8x8xbf16>
      tpu.vector_store %arg15[%c0_63, %c0_64, %c0_65], %93 {strides = array<i32>} : memref<4x8x8xbf16, #tpu.memory_space<vmem>>, vector<4x8x8xbf16>,
    } else {
    }
    %c8_i32 = arith.constant 8 : i32
    %3 = arith.muli %arg1, %c8_i32 : i32
    %4 = tpu.assume_multiple %3, 8 : i32
    %c0 = arith.constant 0 : index
    %5 = arith.index_cast %4 : i32 to index
    %c0_1 = arith.constant 0 : index
    %6 = vector.load %arg13[%c0, %5, %c0_1] : memref<4x8x8xbf16, #tpu.memory_space<vmem>>, vector<4x8x8xbf16>
    %c0_2 = arith.constant 0 : index
    %c0_3 = arith.constant 0 : index
    %c0_4 = arith.constant 0 : index
    %7 = vector.load %arg14[%c0_2, %c0_3, %c0_4] : memref<4x8x8xbf16, #tpu.memory_space<vmem>>, vector<4x8x8xbf16>
    "tpu.trace_start"() <{level = 10 : i32, message = "hqd,hkd->hqk"}> : () -> ()
    %cst = arith.constant dense<0.000000e+00> : vector<4x8x8xf32>
    %8 = tpu.matmul %6, %7, %cst {dimension_numbers = #tpu.dot_dimension_numbers<[2], [2], [1], [1], [0, 0, 0, 1, 1, 1], [0], [0]>} : vector<4x8x8xbf16>, vector<4x8x8xbf16>, vector<4x8x8xf32> -> vector<4x8x8xf32>
    "tpu.trace_stop"() : () -> ()
    %c0_5 = arith.constant 0 : index
    %c0_6 = arith.constant 0 : index
    %c0_7 = arith.constant 0 : index
    %9 = vector.load %arg3[%c0_5, %c0_6, %c0_7] : memref<1x1x8xf32, #tpu.memory_space<vmem>>, vector<1x1x8xf32>
    %10 = vector.shape_cast %9 : vector<1x1x8xf32> to vector<1x8xf32>
    %cst_8 = arith.constant 5.000000e-01 : f32
    %11 = vector.broadcast %cst_8 : f32 to vector<1x8xf32>
    %12 = arith.cmpf ogt, %10, %11 : vector<1x8xf32>
    %cst_9 = arith.constant 0.353553385 : f32
    %13 = vector.broadcast %cst_9 : f32 to vector<4x8x8xf32>
    %14 = arith.mulf %8, %13 : vector<4x8x8xf32>
    %cst_10 = arith.constant -1.000000e+09 : f32
    %15 = vector.shape_cast %12 : vector<1x8xi1> to vector<1x1x8xi1>
    %16 = vector.broadcast %15 : vector<1x1x8xi1> to vector<4x8x8xi1>
    %17 = vector.broadcast %cst_10 : f32 to vector<4x8x8xf32>
    %18 = arith.select %16, %17, %14 : vector<4x8x8xi1>, vector<4x8x8xf32>
    %c0_11 = arith.constant 0 : index
    %c0_12 = arith.constant 0 : index
    %c0_13 = arith.constant 0 : index
    %19 = vector.load %arg4[%c0_11, %c0_12, %c0_13] : memref<1x8x8xf32, #tpu.memory_space<vmem>>, vector<1x8x8xf32>
    %20 = vector.shape_cast %19 : vector<1x8x8xf32> to vector<8x8xf32>
    %cst_14 = arith.constant 1.000000e+00 : f32
    %21 = vector.broadcast %cst_14 : f32 to vector<8x8xf32>
    %22 = arith.addf %21, %20 : vector<8x8xf32>
    %23 = vector.shape_cast %22 : vector<8x8xf32> to vector<1x8x8xf32>
    %24 = vector.broadcast %23 : vector<1x8x8xf32> to vector<4x8x8xf32>
    %25 = arith.mulf %18, %24 : vector<4x8x8xf32>
    %cst_15 = arith.constant dense<0xFF800000> : vector<4x8xf32>
    %26 = vector.multi_reduction <maximumf>, %25, %cst_15 [2] : vector<4x8x8xf32> to vector<4x8xf32>
    %27 = vector.shape_cast %26 : vector<4x8xf32> to vector<4x8x1xf32>
    %28 = vector.broadcast %27 : vector<4x8x1xf32> to vector<4x8x8xf32>
    %29 = arith.subf %25, %28 : vector<4x8x8xf32>
    %30 = math.exp %29 : vector<4x8x8xf32>
    %cst_16 = arith.constant dense<0.000000e+00> : vector<4x8xf32>
    %31 = vector.multi_reduction <add>, %30, %cst_16 [2] : vector<4x8x8xf32> to vector<4x8xf32>
    %32 = vector.shape_cast %31 : vector<4x8xf32> to vector<4x8x1xf32>
    %33 = tpu.reciprocal %32 {approx = true} : vector<4x8x1xf32> -> vector<4x8x1xf32>
    %34 = vector.broadcast %33 : vector<4x8x1xf32> to vector<4x8x8xf32>
    %35 = arith.mulf %30, %34 : vector<4x8x8xf32>
    %c0_17 = arith.constant 0 : index
    %c0_18 = arith.constant 0 : index
    %c0_19 = arith.constant 0 : index
    %c0_20 = arith.constant 0 : index
    %36 = vector.load %arg12[%c0_17, %c0_18, %c0_19, %c0_20] : memref<1x4x8x8xf32, #tpu.memory_space<vmem>>, vector<1x4x8x8xf32>
    %37 = vector.shape_cast %36 : vector<1x4x8x8xf32> to vector<4x8x8xf32>
    %38 = vector.shape_cast %35 : vector<4x8x8xf32> to vector<1x4x8x8xf32>
    tpu.vector_store %arg12[%c0_17, %c0_18, %c0_19, %c0_20], %38 {strides = array<i32>} : memref<1x4x8x8xf32, #tpu.memory_space<vmem>>, vector<1x4x8x8xf32>,
    %39 = arith.truncf %35 : vector<4x8x8xf32> to vector<4x8x8xbf16>
    %c0_21 = arith.constant 0 : index
    %c0_22 = arith.constant 0 : index
    %c0_23 = arith.constant 0 : index
    %40 = vector.load %arg15[%c0_21, %c0_22, %c0_23] : memref<4x8x8xbf16, #tpu.memory_space<vmem>>, vector<4x8x8xbf16>
    "tpu.trace_start"() <{level = 10 : i32, message = "hqk,hkd->hqd"}> : () -> ()
    %cst_24 = arith.constant dense<0.000000e+00> : vector<4x8x8xf32>
    %41 = tpu.matmul %39, %40, %cst_24 {dimension_numbers = #tpu.dot_dimension_numbers<[2], [1], [1], [2], [0, 0, 0, 1, 1, 2], [0], [0]>} : vector<4x8x8xbf16>, vector<4x8x8xbf16>, vector<4x8x8xf32> -> vector<4x8x8xf32>
    "tpu.trace_stop"() : () -> ()
    %42 = arith.truncf %41 : vector<4x8x8xf32> to vector<4x8x8xbf16>
    %c0_25 = arith.constant 0 : index
    %c0_26 = arith.constant 0 : index
    %c0_27 = arith.constant 0 : index
    %43 = vector.load %arg10[%c0_25, %c0_26, %c0_27] : memref<4x8x32xbf16, #tpu.memory_space<vmem>>, vector<4x8x32xbf16>
    "tpu.trace_start"() <{level = 10 : i32, message = "hqd,hde->hqe"}> : () -> ()
    %cst_28 = arith.constant dense<0.000000e+00> : vector<4x8x32xf32>
    %44 = tpu.matmul %42, %43, %cst_28 {dimension_numbers = #tpu.dot_dimension_numbers<[2], [1], [1], [2], [0, 0, 0, 1, 1, 2], [0], [0]>} : vector<4x8x8xbf16>, vector<4x8x32xbf16>, vector<4x8x32xf32> -> vector<4x8x32xf32>
    "tpu.trace_stop"() : () -> ()
    %cst_29 = arith.constant dense<0.000000e+00> : vector<8x32xf32>
    %45 = vector.multi_reduction <add>, %44, %cst_29 [0] : vector<4x8x32xf32> to vector<8x32xf32>
    %c0_30 = arith.constant 0 : index
    %c0_31 = arith.constant 0 : index
    %c0_32 = arith.constant 0 : index
    %46 = vector.load %arg11[%c0_30, %c0_31, %c0_32] : memref<1x8x32xf32, #tpu.memory_space<vmem>>, vector<1x8x32xf32>
    %47 = vector.shape_cast %46 : vector<1x8x32xf32> to vector<8x32xf32>
    %48 = vector.shape_cast %45 : vector<8x32xf32> to vector<1x8x32xf32>
    tpu.vector_store %arg11[%c0_30, %c0_31, %c0_32], %48 {strides = array<i32>} : memref<1x8x32xf32, #tpu.memory_space<vmem>>, vector<1x8x32xf32>,
    return
  }
  func.func @transform_0(%arg0: i32, %arg1: i32) -> (i32, i32, i32) {
    %c0_i32 = arith.constant 0 : i32
    %c0_i32_0 = arith.constant 0 : i32
    %c0_i32_1 = arith.constant 0 : i32
    return %arg0, %c0_i32, %c0_i32_0 : i32, i32, i32
  }
  func.func @transform_1(%arg0: i32, %arg1: i32) -> (i32, i32, i32) {
    %c0_i32 = arith.constant 0 : i32
    %c0_i32_0 = arith.constant 0 : i32
    %c0_i32_1 = arith.constant 0 : i32
    return %arg0, %c0_i32, %c0_i32_0 : i32, i32, i32
  }
  func.func @transform_2(%arg0: i32, %arg1: i32) -> (i32, i32, i32) {
    %c0_i32 = arith.constant 0 : i32
    %c0_i32_0 = arith.constant 0 : i32
    return %arg0, %arg1, %c0_i32 : i32, i32, i32
  }
  func.func @transform_3(%arg0: i32, %arg1: i32) -> (i32, i32) {
    %c0_i32 = arith.constant 0 : i32
    %c0_i32_0 = arith.constant 0 : i32
    %c0_i32_1 = arith.constant 0 : i32
    return %c0_i32, %c0_i32_0 : i32, i32
  }
  func.func @transform_4(%arg0: i32, %arg1: i32) -> (i32, i32) {
    %c0_i32 = arith.constant 0 : i32
    %c0_i32_0 = arith.constant 0 : i32
    %c0_i32_1 = arith.constant 0 : i32
    return %c0_i32, %c0_i32_0 : i32, i32
  }
  func.func @transform_5(%arg0: i32, %arg1: i32) -> (i32, i32, i32) {
    %c0_i32 = arith.constant 0 : i32
    %c0_i32_0 = arith.constant 0 : i32
    %c0_i32_1 = arith.constant 0 : i32
    %c0_i32_2 = arith.constant 0 : i32
    return %c0_i32, %c0_i32_0, %c0_i32_1 : i32, i32, i32
  }
  func.func @transform_6(%arg0: i32, %arg1: i32) -> (i32, i32, i32) {
    %c0_i32 = arith.constant 0 : i32
    %c0_i32_0 = arith.constant 0 : i32
    %c0_i32_1 = arith.constant 0 : i32
    %c0_i32_2 = arith.constant 0 : i32
    return %c0_i32, %c0_i32_0, %c0_i32_1 : i32, i32, i32
  }
  func.func @transform_7(%arg0: i32, %arg1: i32) -> (i32, i32, i32) {
    %c0_i32 = arith.constant 0 : i32
    %c0_i32_0 = arith.constant 0 : i32
    %c0_i32_1 = arith.constant 0 : i32
    %c0_i32_2 = arith.constant 0 : i32
    return %c0_i32, %c0_i32_0, %c0_i32_1 : i32, i32, i32
  }
  func.func @transform_8(%arg0: i32, %arg1: i32) -> (i32, i32, i32) {
    %c0_i32 = arith.constant 0 : i32
    %c0_i32_0 = arith.constant 0 : i32
    %c0_i32_1 = arith.constant 0 : i32
    %c0_i32_2 = arith.constant 0 : i32
    return %c0_i32, %c0_i32_0, %c0_i32_1 : i32, i32, i32
  }
  func.func @transform_9(%arg0: i32, %arg1: i32) -> (i32, i32, i32) {
    %c0_i32 = arith.constant 0 : i32
    %c0_i32_0 = arith.constant 0 : i32
    return %arg0, %arg1, %c0_i32 : i32, i32, i32
  }
  func.func @transform_10(%arg0: i32, %arg1: i32) -> (i32, i32, i32, i32) {
    %c0_i32 = arith.constant 0 : i32
    %c0_i32_0 = arith.constant 0 : i32
    %c0_i32_1 = arith.constant 0 : i32
    return %arg0, %c0_i32, %arg1, %c0_i32_0 : i32, i32, i32, i32
  }
}

</mosaic_0001>

<bundles_post_ra>
// kernel: tpu_custom_call.1
= control target key start
LH: loop header
LB: loop body
LE: loop exit
PB: predicated region body
PF: predicated region fallthrough
CT: control target
= control target key end

     0   :  { %s2988_s0 = inlined_call_operand.vmem [shape: f32[2,8,32], index: 0, kind: input, shape index: {}]   ;;  %s2989_s1 = inlined_call_operand.vmem [shape: f32[2,1,8], index: 1, kind: input, shape index: {}]   ;;  %s2990_s2 = inlined_call_operand.vmem [shape: f32[2,8,8], index: 2, kind: input, shape index: {}]   ;;  %s2991_s3 = inlined_call_operand.vmem [shape: f32[1,32], index: 3, kind: input, shape index: {}]   ;;  %s2992_s4 = inlined_call_operand.vmem [shape: f32[1,32], index: 4, kind: input, shape index: {}]   ;;  %s2993_s5 = inlined_call_operand.vmem [shape: bf16[4,32,8], index: 5, kind: input, shape index: {}]   ;;  %s2994_s6 = inlined_call_operand.vmem [shape: bf16[4,32,8], index: 6, kind: input, shape index: {}]   ;;  %s2995_s7 = inlined_call_operand.vmem [shape: bf16[4,32,8], index: 7, kind: input, shape index: {}]   ;;  %s2996_s8 = inlined_call_operand.vmem [shape: bf16[4,8,32], index: 8, kind: input, shape index: {}]   ;;  %s2997_s9 = inlined_call_operand.hbm [shape: f32[2,8,32], index: 9, kind: output, shape index: {0}]   ;;  %s2998_s10 = inlined_call_operand.hbm [shape: f32[2,4,8,8], index: 10, kind: output, shape index: {1}]  }
   0x1   :  { %2999 = sst [smem:[#allocation11_spill]] %s2988_s0 }
   0x2   :  { %3000 = sst [smem:[#allocation12_spill]] %s2989_s1 }
   0x3   :  { %16 = vsyncpa [#allocation6], 0 }
   0x4   :  { %18 = vsyncpa [#allocation6 + $0x1], 0 }
   0x5   :  { %19 = vsyncpa [#allocation8], 0 }
   0x6   :  { %21 = vsyncpa [#allocation8 + $0x1], 0  ;;  %s2561_s13 = smov 0   ;;  %s2563_s14 = smov 0  }
   0x7   :  { %s2565_s15 = smov 0   ;;  %s2567_s16 = smov 0  }
   0x8   :  { %s2569_s17 = smov 0   ;;  %s2571_s18 = smov 0  }
   0x9 LB: > { %s1989_s19 = sadd.s32 4294967295, %s2497_s18   ;;  %s1990_s20 = sadd.s32 4294967294, %s2497_s18   ;;  %s2497_s18 = sphi %s2571_s18, %s27_s18   ;;  %s2493_s17 = sphi %s2569_s17, %s3010_s17   ;;  %s2489_s16 = sphi %s2567_s16, %s3009_s16   ;;  %s2485_s15 = sphi %s2565_s15, %s3008_s15   ;;  %s2481_s14 = sphi %s2563_s14, %s3007_s14   ;;  %s2477_s13 = sphi %s2561_s13, %s3006_s13  }
   0xa   : > { %s39_s21 = sadd.s32 1, %s2493_s17  ;;  %s254_s22 = sadd.s32 1, %s2485_s15 }
   0xb   : > { %p41_p0 = scmp.ge.s32.totalorder %s39_s21, 2  ;;  %p264_p1 = scmp.ne.s32.totalorder %s2485_s15, %s2481_s14 }
   0xc   : > { %p265_p2 = scmp.eq.s32.totalorder %s1989_s19, 1  ;;  %p270_p3 = scmp.ne.s32.totalorder %s2481_s14, %s2477_s13 }
   0xd   : > { %s3012_s21 = smov (%p41_p0, %s39_s21), 0  ;;  %p271_p5 = scmp.eq.s32.totalorder %s1990_s20, 1 }
   0xe   : > { %p2601_p4 = por %p265_p2, %p264_p1  ;;  %s249_s24 = ssub.s32 %s2493_s17, %s3012_s21 }
   0xf   : > { %p1993_p6 = scmp.ge.s32.totalorder %s2497_s18, 1  ;;  %p252_p7 = scmp.eq.s32.totalorder %s249_s24, 0 }
  0x10   : > { %p2608_p8 = por %p271_p5, %p270_p3  ;;  %p358_p9 = scmp.lt.s32.totalorder %s2497_s18, 3 }
  0x11   : > { %s2614_s26 = scalar_select %p252_p7, %s2485_s15, %s254_s22  }
  0x12   : > { %p359_p10 = pnand %p1993_p6, %p358_p9 }
  0x13   : > { %p410_p11 = scmp.lt.s32.totalorder (!%p359_p10), %s2489_s16, 1  ;;  %s3003_s0 = sld [smem:[#allocation11_spill]] (!%p359_p10) }
  0x14   : > { %362 = sbr.rel (%p359_p10) target bundleno = 1495 (0x5d7), region = 56  ;;  %s3004_s1 = sld [smem:[#allocation12_spill]] (!%p359_p10) }
  0x15   : > { %s2055_s24 = sshll.u32 (!%p359_p10), %s2489_s16, 9 }
  0x19   : > { %s2618_s27 = scalar_select %p410_p11, %s2489_s16, 1  ;;  %vm430_vm0 = vcmask 261120   ;;  %v2349_v7 = vld [vmem:[%s2993_s5 + $0x8] sm:$0xff]   ;;  %v2350_v8 = vld [vmem:[%s2993_s5 + $0x18] sm:$0xff]   ;;  %v2499_v9 = vmov 0.0   ;;  %v2351_v10 = vld [vmem:[%s2993_s5] sm:$0xff]  }
  0x1a   : > { %2116 = vmatprep.subr.bf16.mxu0 %v2499_v9  ;;  %2124 = vmatprep.subr.bf16.mxu1 %v2499_v9  ;;  %v2352_v11 = vld [vmem:[%s2993_s5 + $0x10] sm:$0xff]   ;;  %vm2500_vm1 = vmmov 0   ;;  %v1998_v16 = vld [vmem:[%s2991_s3] ss:$0 sm:$0xff]  ;;  %v2353_v21 = vld [vmem:[%s2993_s5 + $0x28] sm:$0xff]   ;;  %vm693_vm2 = vcmask 60416  }
  0x1b   : > { %s1996_s28 = sshll.u32 %s2618_s27, 3  ;;  %2117 = vmatpush3.bf16.msra.mxu0 %v2349_v7  ;;  %2125 = vmatpush3.bf16.msra.mxu1 %v2350_v8  ;;  %v1999_v18 = vld [vmem:[%s2992_s4] ss:$0 sm:$0xff]  ;;  %v2354_v22 = vld [vmem:[%s2993_s5 + $0x38] sm:$0xff]   ;;  %v2356_v25 = vld [vmem:[%s2993_s5 + $0x30] sm:$0xff]   ;;  %vm1175_vm3 = vcmask 64512   ;;  %s416_s30 = scalar_lea.vmem %s3004_s1, %s2618_s27 }
  0x1c   : > { %s413_s11 = scalar_lea.vmem %s3003_s0, %s1996_s28  ;;  %2118 = vmatprep.subr.bf16.mxu0 %v2499_v9  ;;  %2126 = vmatprep.subr.bf16.mxu1 %v2499_v9  ;;  %v2355_v24 = vld [vmem:[%s2993_s5 + $0x20] sm:$0xff]   ;;  %v2357_v26 = vld [vmem:[%s2994_s6 + $0x8] sm:$0xff]   ;;  %v2358_v27 = vld [vmem:[%s2994_s6 + $0x18] sm:$0xff]   ;;  %vm1441_vm4 = vcmask 1043456   ;;  %s423_s19 = scalar_lea.vmem %s2990_s2, %s1996_s28 }
  0x1d   : > { %v429_v0 = vld [vmem:[%s413_s11] sm:$0xff]  ;;  %2120 = vmatprep.mubr.msk.bf16.mxu0 %vm2500_vm1, %v2499_v9  ;;  %2128 = vmatprep.mubr.msk.bf16.mxu1 %vm2500_vm1, %v2499_v9  ;;  %v2360_v29 = vld [vmem:[%s2994_s6 + $0x10] sm:$0xff]   ;;  %v2361_v30 = vld [vmem:[%s2994_s6 + $0x28] sm:$0xff]   ;;  %s2844_s27 = sand.u32 1, %s2481_s14   ;;  %s2906_s11 = scalar_lea.hbm %s2998_s10, %s2055_s24 }
  0x1e   : > { %v431_v1 = vsel %vm430_vm0, %v429_v0, 0.0  ;;  %v2359_v28 = vld [vmem:[%s2994_s6] sm:$0xff]   ;;  %v2362_v31 = vld [vmem:[%s2994_s6 + $0x38] sm:$0xff]   ;;  %v2364_v33 = vld [vmem:[%s2994_s6 + $0x30] sm:$0xff]   ;;  %s1995_s28 = sshll.u32 %s2844_s27, 5 }
  0x1f   : > { %432 = vadd.xlane.f32.xlu0 %v431_v1  ;;  %2119 = vmatpush3.bf16.msra.mxu0 %v2351_v10  ;;  %v2363_v32 = vld [vmem:[%s2994_s6 + $0x20] sm:$0xff]   ;;  %v2365_v34 = vld [vmem:[%s2995_s7 + $0x8] sm:$0xff]   ;;  %v2366_v35 = vld [vmem:[%s2995_s7 + $0x18] sm:$0xff]   ;;  %s2847_s20 = scalar_lea.vmem [#allocation7], %s1995_s28  ;;  %s2502_s28 = smov [#allocation7]  }
  0x20   : > { %2127 = vmatpush3.bf16.msra.mxu1 %v2352_v11  ;;  %2132 = vmatprep.subr.bf16.mxu0 %v2499_v9  ;;  %v2367_v36 = vld [vmem:[%s2995_s7] sm:$0xff]   ;;  %v2368_v37 = vld [vmem:[%s2995_s7 + $0x10] sm:$0xff]   ;;  %v2369_v38 = vld [vmem:[%s2995_s7 + $0x28] sm:$0xff]   ;;  %s1858_s22 = sshll.u32 %s2847_s20, 4  ;;  %s2395_s0 = sshll.u32 %s2502_s28, 4  ;;  %s2901_s22 = int_to_ptr.vmem [resolvable:$true] %s1858_s22  ;;  %s2396_s0 = int_to_ptr.vmem [resolvable:$false] %s2395_s0 }
  0x21   : > { %2140 = vmatprep.subr.bf16.mxu1 %v2499_v9  ;;  %v2370_v39 = vld [vmem:[%s2995_s7 + $0x38] sm:$0xff]   ;;  %v2371_v40 = vld [vmem:[%s2995_s7 + $0x20] sm:$0xff]   ;;  %v2372_v41 = vld [vmem:[%s2995_s7 + $0x30] sm:$0xff]   ;;  %p2398_p1 = scmp.lt.s32.totalorder %s2901_s22, %s2396_s0 }
  0xa8   : > { %v433_v2 = vpop.xlane.xlu0 %432 }
  0xa9   : > { %v435_v3 = vmul.f32 0.03125, %v433_v2 }
  0xab   : > { %v436_v4 = vsub.f32 %v429_v0, %v435_v3 }
  0xad   : > { %v437_v5 = vmul.f32 %v436_v4, %v436_v4 }
  0xaf   : > { %v438_v6 = vsel %vm430_vm0, %v437_v5, 0.0 }
  0xb0   : > { %439 = vadd.xlane.f32.xlu0 %v438_v6 }
 0x139   : > { %v440_v12 = vpop.xlane.xlu0 %439 }
 0x13a   : > { %v441_v13 = vmul.f32 0.03125, %v440_v12 }
 0x13c   : > { %v442_v14 = vadd.f32 1e-05, %v441_v13 }
 0x13e   : > { %2373 = vrsqrt.f32 %v442_v14 }
 0x14b   : > { %v2374_v15 = vpop.eup %2373 }
 0x14c   : > { %v444_v17 = vmul.f32 %v2374_v15, %v436_v4 }
 0x14e   : > { %v452_v19 = vmul.f32 %v1998_v16, %v444_v17 }
 0x150   : > { %v460_v20 = vadd.f32 %v1999_v18, %v452_v19 }
 0x152   : > { %v2662_v23 = vpack.c.bf16 %v460_v20, %v460_v20 }
 0x154   : > { %2121 = vmatmul.mubr.msk.bf16.vlgmr.msra.gmra.mxu0 %vm430_vm0, %v2662_v23  ;;  %2129 = vmatmul.mubr.msk.bf16.vlgmr.msra.gmra.mxu1 %vm430_vm0, %v2662_v23 }
 0x155   : > { %2133 = vmatpush3.bf16.msra.mxu0 %v2353_v21  ;;  %2141 = vmatpush3.bf16.msra.mxu1 %v2354_v22 }
 0x156   : > { %2134 = vmatprep.subr.bf16.mxu0 %v2499_v9  ;;  %2142 = vmatprep.subr.bf16.mxu1 %v2499_v9 }
 0x157   : > { %2136 = vmatprep.mubr.msk.bf16.mxu0 %vm2500_vm1, %v2499_v9  ;;  %2144 = vmatprep.mubr.msk.bf16.mxu1 %vm2500_vm1, %v2499_v9 }
 0x159   : > { %2135 = vmatpush3.bf16.msra.mxu0 %v2355_v24  ;;  %2143 = vmatpush3.bf16.msra.mxu1 %v2356_v25 }
 0x15a   : > { %2148 = vmatprep.subr.bf16.mxu0 %v2499_v9  ;;  %2156 = vmatprep.subr.bf16.mxu1 %v2499_v9 }
 0x15c   : > { %2137 = vmatmul.mubr.msk.bf16.vlgmr.msra.gmra.mxu0 %vm430_vm0, %v2662_v23  ;;  %2145 = vmatmul.mubr.msk.bf16.vlgmr.msra.gmra.mxu1 %vm430_vm0, %v2662_v23 }
 0x15d   : > { %2149 = vmatpush3.bf16.msra.mxu0 %v2357_v26  ;;  %2157 = vmatpush3.bf16.msra.mxu1 %v2358_v27 }
 0x15e   : > { %2150 = vmatprep.subr.bf16.mxu0 %v2499_v9  ;;  %2158 = vmatprep.subr.bf16.mxu1 %v2499_v9 }
 0x15f   : > { %2152 = vmatprep.mubr.msk.bf16.mxu0 %vm2500_vm1, %v2499_v9  ;;  %2160 = vmatprep.mubr.msk.bf16.mxu1 %vm2500_vm1, %v2499_v9 }
 0x161   : > { %2151 = vmatpush3.bf16.msra.mxu0 %v2359_v28  ;;  %2159 = vmatpush3.bf16.msra.mxu1 %v2360_v29 }
 0x162   : > { %2164 = vmatprep.subr.bf16.mxu0 %v2499_v9  ;;  %2172 = vmatprep.subr.bf16.mxu1 %v2499_v9 }
 0x164   : > { %2153 = vmatmul.mubr.msk.bf16.vlgmr.msra.gmra.mxu0 %vm430_vm0, %v2662_v23  ;;  %2161 = vmatmul.mubr.msk.bf16.vlgmr.msra.gmra.mxu1 %vm430_vm0, %v2662_v23 }
 0x165   : > { %2165 = vmatpush3.bf16.msra.mxu0 %v2361_v30  ;;  %2173 = vmatpush3.bf16.msra.mxu1 %v2362_v31 }
 0x166   : > { %2166 = vmatprep.subr.bf16.mxu0 %v2499_v9  ;;  %2174 = vmatprep.subr.bf16.mxu1 %v2499_v9 }
 0x167   : > { %2168 = vmatprep.mubr.msk.bf16.mxu0 %vm2500_vm1, %v2499_v9  ;;  %2176 = vmatprep.mubr.msk.bf16.mxu1 %vm2500_vm1, %v2499_v9 }
 0x169   : > { %2167 = vmatpush3.bf16.msra.mxu0 %v2363_v32  ;;  %2175 = vmatpush3.bf16.msra.mxu1 %v2364_v33 }
 0x16a   : > { %2180 = vmatprep.subr.bf16.mxu0 %v2499_v9  ;;  %2188 = vmatprep.subr.bf16.mxu1 %v2499_v9 }
 0x16c   : > { %2169 = vmatmul.mubr.msk.bf16.vlgmr.msra.gmra.mxu0 %vm430_vm0, %v2662_v23  ;;  %2177 = vmatmul.mubr.msk.bf16.vlgmr.msra.gmra.mxu1 %vm430_vm0, %v2662_v23 }
 0x16d   : > { %2181 = vmatpush3.bf16.msra.mxu0 %v2365_v34  ;;  %2189 = vmatpush3.bf16.msra.mxu1 %v2366_v35 }
 0x16e   : > { %2182 = vmatprep.subr.bf16.mxu0 %v2499_v9  ;;  %2190 = vmatprep.subr.bf16.mxu1 %v2499_v9 }
 0x16f   : > { %2184 = vmatprep.mubr.msk.bf16.mxu0 %vm2500_vm1, %v2499_v9  ;;  %2192 = vmatprep.mubr.msk.bf16.mxu1 %vm2500_vm1, %v2499_v9 }
 0x171   : > { %2183 = vmatpush3.bf16.msra.mxu0 %v2367_v36  ;;  %2191 = vmatpush3.bf16.msra.mxu1 %v2368_v37 }
 0x172   : > { %2196 = vmatprep.subr.bf16.mxu0 %v2499_v9  ;;  %2204 = vmatprep.subr.bf16.mxu1 %v2499_v9 }
 0x174   : > { %2185 = vmatmul.mubr.msk.bf16.vlgmr.msra.gmra.mxu0 %vm430_vm0, %v2662_v23  ;;  %2193 = vmatmul.mubr.msk.bf16.vlgmr.msra.gmra.mxu1 %vm430_vm0, %v2662_v23 }
 0x175   : > { %2197 = vmatpush3.bf16.msra.mxu0 %v2369_v38  ;;  %2205 = vmatpush3.bf16.msra.mxu1 %v2370_v39 }
 0x176   : > { %2198 = vmatprep.subr.bf16.mxu0 %v2499_v9  ;;  %2206 = vmatprep.subr.bf16.mxu1 %v2499_v9 }
 0x177   : > { %2200 = vmatprep.mubr.msk.bf16.mxu0 %vm2500_vm1, %v2499_v9  ;;  %2208 = vmatprep.mubr.msk.bf16.mxu1 %vm2500_vm1, %v2499_v9 }
 0x179   : > { %2199 = vmatpush3.bf16.msra.mxu0 %v2371_v40  ;;  %2207 = vmatpush3.bf16.msra.mxu1 %v2372_v41 }
 0x17a   : > { %2212 = vmatprep.subr.bf16.mxu0 %v2499_v9  ;;  %2218 = vmatprep.subr.bf16.mxu1 %v2499_v9 }
 0x17c   : > { %2201 = vmatmul.mubr.msk.bf16.vlgmr.msra.gmra.mxu0 %vm430_vm0, %v2662_v23  ;;  %2209 = vmatmul.mubr.msk.bf16.vlgmr.msra.gmra.mxu1 %vm430_vm0, %v2662_v23 }
 0x17d   : > { %2214 = vmatprep.mubr.msk.bf16.mxu0 %vm2500_vm1, %v2499_v9  ;;  %2220 = vmatprep.mubr.msk.bf16.mxu1 %vm2500_vm1, %v2499_v9 }
 0x214   : > { %v527_v42 = vpop.f32.mrf.mxu0  ;;  %v579_v43 = vpop.f32.mrf.mxu1 }
 0x215   : > { %v689_v44 = vpack.c.bf16 %v527_v42, %v527_v42  ;;  %v690_v45 = vpack.c.bf16 %v579_v43, %v579_v43 }
 0x216   : > { %v2122_v46 = vpop.f32.mrf.mxu0  ;;  %v2130_v47 = vpop.f32.mrf.mxu1 }
 0x217   : > { %694 = vst.msk [vmem:[#allocation2] sm:$0xf] %vm693_vm2, %v689_v44  ;;  %695 = vst.msk [vmem:[#allocation2 + $0x4] sm:$0xf] %vm693_vm2, %v690_v45 }
 0x218   : > { %v530_v48 = vpop.f32.mrf.mxu0  ;;  %v582_v49 = vpop.f32.mrf.mxu1 }
 0x21a   : > { %v2123_v50 = vpop.f32.mrf.mxu0  ;;  %v2131_v51 = vpop.f32.mrf.mxu1 }
 0x21c   : > { %v631_v52 = vpop.f32.mrf.mxu0  ;;  %v683_v53 = vpop.f32.mrf.mxu1 }
 0x21d   : > { %v691_v54 = vpack.c.bf16 %v631_v52, %v631_v52  ;;  %v692_v55 = vpack.c.bf16 %v683_v53, %v683_v53 }
 0x21e   : > { %v2138_v56 = vpop.f32.mrf.mxu0  ;;  %v2146_v57 = vpop.f32.mrf.mxu1  ;;  %v1167_v27 = vld [vmem:[#allocation2] sm:$0xf]  ;;  %v1168_v30 = vld [vmem:[#allocation2 + $0x4] sm:$0xf] }
 0x21f   : > { %696 = vst.msk [vmem:[#allocation2 + $0x8] sm:$0xf] %vm693_vm2, %v691_v54  ;;  %697 = vst.msk [vmem:[#allocation2 + $0xc] sm:$0xf] %vm693_vm2, %v692_v55  ;;  %v1367_v55 = vlaneseq  ;;  %v1360_v56 = vld [vmem:[%s416_s30] sm:$0x1] }
 0x220   : > { %v634_v58 = vpop.f32.mrf.mxu0  ;;  %v686_v59 = vpop.f32.mrf.mxu1  ;;  %vm1361_vm5 = vcmp.gt.f32.partialorder %v1360_v56, 0.5 }
 0x221   : > { %v1368_v57 = vshrl.u32 %v1367_v55, 7  ;;  %v2501_v59 = vmov 0  }
 0x222   : > { %v2139_v60 = vpop.f32.mrf.mxu0  ;;  %v2147_v61 = vpop.f32.mrf.mxu1 }
 0x223   : > { %v1369_v58 = vsub.s32 0, %v1368_v57  ;;  %v1366_v60 = vsel %vm1361_vm5, 1, %v2501_v59 }
 0x224   : > { %v760_v62 = vpop.f32.mrf.mxu0  ;;  %v812_v63 = vpop.f32.mrf.mxu1 }
 0x225   : > { %v922_v0 = vpack.c.bf16 %v760_v62, %v760_v62  ;;  %v923_v1 = vpack.c.bf16 %v812_v63, %v812_v63  ;;  %v1370_v61 = vrot.slane %v1366_v60, %v1369_v58  ;;  %v1376_v62 = vld [vmem:[%s423_s19] sm:$0xff]  ;;  %s2391_s19 = scalar_lea.vmem %s2901_s22, 512 }
 0x226   : > { %v2154_v2 = vpop.f32.mrf.mxu0  ;;  %v2162_v3 = vpop.f32.mrf.mxu1  ;;  %v1169_v43 = vld [vmem:[#allocation2 + $0x8] sm:$0xf]  ;;  %v1170_v46 = vld [vmem:[#allocation2 + $0xc] sm:$0xf]  ;;  %v1377_v63 = vadd.f32 1.0, %v1376_v62  ;;  %p2392_p12 = scmp.ne.s32.totalorder %s2901_s22, %s2391_s19 }
 0x227   : > { %926 = vst.msk [vmem:[#allocation3] sm:$0xf] %vm693_vm2, %v922_v0  ;;  %927 = vst.msk [vmem:[#allocation3 + $0x4] sm:$0xf] %vm693_vm2, %v923_v1  ;;  %vm1371_vm6 = vcmp.eq.s32.totalorder %v1370_v61, 1 }
 0x228   : > { %v763_v4 = vpop.f32.mrf.mxu0  ;;  %v815_v5 = vpop.f32.mrf.mxu1  ;;  %p2393_p13 = pnand %p2392_p12, %p2601_p4 }
 0x22a   : > { %v2155_v6 = vpop.f32.mrf.mxu0  ;;  %v2163_v7 = vpop.f32.mrf.mxu1  ;;  %p2394_p0 = pneg %p2393_p13 }
 0x22c   : > { %v864_v8 = vpop.f32.mrf.mxu0  ;;  %v916_v10 = vpop.f32.mrf.mxu1 }
 0x22d   : > { %v924_v11 = vpack.c.bf16 %v864_v8, %v864_v8  ;;  %v925_v12 = vpack.c.bf16 %v916_v10, %v916_v10 }
 0x22e   : > { %v2170_v13 = vpop.f32.mrf.mxu0  ;;  %v2178_v14 = vpop.f32.mrf.mxu1  ;;  %v1171_v15 = vld [vmem:[#allocation3] sm:$0xf]  ;;  %v1172_v16 = vld [vmem:[#allocation3 + $0x4] sm:$0xf] }
 0x22f   : > { %928 = vst.msk [vmem:[#allocation3 + $0x8] sm:$0xf] %vm693_vm2, %v924_v11  ;;  %929 = vst.msk [vmem:[#allocation3 + $0xc] sm:$0xf] %vm693_vm2, %v925_v12  ;;  %v1180_v17 = vsel %vm1175_vm3, %v1171_v15, 0  ;;  %v1226_v18 = vsel %vm1175_vm3, %v1172_v16, 0 }
 0x230   : > { %v867_v19 = vpop.f32.mrf.mxu0  ;;  %v919_v20 = vpop.f32.mrf.mxu1  ;;  %2213 = vmatpush3.bf16.xpose.msra.mxu0 %v1180_v17  ;;  %2219 = vmatpush3.bf16.xpose.msra.mxu1 %v1226_v18 }
 0x231   : > { %2224 = vmatprep.subr.bf16.mxu0 %v2499_v9  ;;  %2230 = vmatprep.subr.bf16.mxu1 %v2499_v9 }
 0x232   : > { %v2171_v21 = vpop.f32.mrf.mxu0  ;;  %v2179_v22 = vpop.f32.mrf.mxu1 }
 0x234   : > { %v992_v23 = vpop.f32.mrf.mxu0  ;;  %v1044_v24 = vpop.f32.mrf.mxu1 }
 0x235   : > { %v1154_v25 = vpack.c.bf16 %v992_v23, %v992_v23  ;;  %v1155_v26 = vpack.c.bf16 %v1044_v24, %v1044_v24 }
 0x236   : > { %v2186_v28 = vpop.f32.mrf.mxu0  ;;  %v2194_v29 = vpop.f32.mrf.mxu1  ;;  %v1173_v31 = vld [vmem:[#allocation3 + $0x8] sm:$0xf]  ;;  %v1174_v32 = vld [vmem:[#allocation3 + $0xc] sm:$0xf] }
 0x237   : > { %1158 = vst.msk [vmem:[#allocation4] sm:$0xf] %vm693_vm2, %v1154_v25  ;;  %1159 = vst.msk [vmem:[#allocation4 + $0x4] sm:$0xf] %vm693_vm2, %v1155_v26  ;;  %2215 = vmatmul.mubr.msk.bf16.vlgmr.msra.gmra.mxu0 %vm1175_vm3, %v1167_v27  ;;  %2221 = vmatmul.mubr.msk.bf16.vlgmr.msra.gmra.mxu1 %vm1175_vm3, %v1168_v30  ;;  %v1272_v33 = vsel %vm1175_vm3, %v1173_v31, 0  ;;  %v1318_v34 = vsel %vm1175_vm3, %v1174_v32, 0 }
 0x238   : > { %v995_v35 = vpop.f32.mrf.mxu0  ;;  %v1047_v36 = vpop.f32.mrf.mxu1  ;;  %2225 = vmatpush3.bf16.xpose.msra.mxu0 %v1272_v33  ;;  %2231 = vmatpush3.bf16.xpose.msra.mxu1 %v1318_v34 }
 0x239   : > { %2226 = vmatprep.mubr.msk.bf16.mxu0 %vm2500_vm1, %v2499_v9  ;;  %2232 = vmatprep.mubr.msk.bf16.mxu1 %vm2500_vm1, %v2499_v9 }
 0x23a   : > { %v2187_v37 = vpop.f32.mrf.mxu0  ;;  %v2195_v38 = vpop.f32.mrf.mxu1  ;;  %2236 = vmatprep.subr.bf16.mxu0 %v2499_v9  ;;  %2242 = vmatprep.subr.bf16.mxu1 %v2499_v9 }
 0x23c   : > { %v1096_v39 = vpop.f32.mrf.mxu0  ;;  %v1148_v40 = vpop.f32.mrf.mxu1 }
 0x23d   : > { %v1156_v41 = vpack.c.bf16 %v1096_v39, %v1096_v39  ;;  %v1157_v42 = vpack.c.bf16 %v1148_v40, %v1148_v40 }
 0x23e   : > { %v2202_v44 = vpop.f32.mrf.mxu0  ;;  %v2210_v45 = vpop.f32.mrf.mxu1  ;;  %v1434_v47 = vld [vmem:[#allocation4] sm:$0xf]  ;;  %v1435_v48 = vld [vmem:[#allocation4 + $0x4] sm:$0xf] }
 0x23f   : > { %1160 = vst.msk [vmem:[#allocation4 + $0x8] sm:$0xf] %vm693_vm2, %v1156_v41  ;;  %1161 = vst.msk [vmem:[#allocation4 + $0xc] sm:$0xf] %vm693_vm2, %v1157_v42  ;;  %2227 = vmatmul.mubr.msk.bf16.vlgmr.msra.gmra.mxu0 %vm1175_vm3, %v1169_v43  ;;  %2233 = vmatmul.mubr.msk.bf16.vlgmr.msra.gmra.mxu1 %vm1175_vm3, %v1170_v46  ;;  %v1443_v49 = vsel %vm1441_vm4, %v1434_v47, 0  ;;  %v1489_v50 = vsel %vm1441_vm4, %v1435_v48, 0 }
 0x240   : > { %v1099_v51 = vpop.f32.mrf.mxu0  ;;  %v1151_v52 = vpop.f32.mrf.mxu1  ;;  %2237 = vmatpush3.bf16.msra.mxu0 %v1443_v49  ;;  %2243 = vmatpush3.bf16.msra.mxu1 %v1489_v50 }
 0x241   : > { %2238 = vmatprep.mubr.msk.bf16.mxu0 %vm2500_vm1, %v2499_v9  ;;  %2248 = vmatprep.subr.bf16.mxu0 %v2499_v9 }
 0x242   : > { %v2203_v53 = vpop.f32.mrf.mxu0  ;;  %v2211_v54 = vpop.f32.mrf.mxu1  ;;  %2244 = vmatprep.mubr.msk.bf16.mxu1 %vm2500_vm1, %v2499_v9  ;;  %2254 = vmatprep.subr.bf16.mxu1 %v2499_v9 }
 0x246   : > { %v1436_v59 = vld [vmem:[#allocation4 + $0x8] sm:$0xf] }
 0x247   : > { %v1535_v62 = vsel %vm1441_vm4, %v1436_v59, 0 }
 0x2f7   : > { %v1216_v0 = vpop.f32.mrf.mxu0  ;;  %v1262_v1 = vpop.f32.mrf.mxu1 }
 0x2f8   : > { %v1362_v2 = vmul.f32 0.35355338, %v1216_v0  ;;  %v1363_v3 = vmul.f32 0.35355338, %v1262_v1  ;;  %v1437_v0 = vld [vmem:[#allocation4 + $0xc] sm:$0xf] }
 0x2f9   : > { %v2216_v4 = vpop.f32.mrf.mxu0  ;;  %v2222_v5 = vpop.f32.mrf.mxu1 }
 0x2fa   : > { %v1372_v6 = vsel %vm1371_vm6, -1e+09, %v1362_v2  ;;  %v1373_v7 = vsel %vm1371_vm6, -1e+09, %v1363_v3  ;;  %v1581_v5 = vsel %vm1441_vm4, %v1437_v0, 0 }
 0x2fb   : > { %v1219_v8 = vpop.f32.mrf.mxu0  ;;  %v1265_v10 = vpop.f32.mrf.mxu1  ;;  %v1378_v11 = vmul.f32 %v1377_v63, %v1372_v6  ;;  %v1379_v12 = vmul.f32 %v1377_v63, %v1373_v7  ;;  %v1627_v6 = vld [vmem:[%s2996_s8] sm:$0xf] }
 0x2fc   : > { %v1635_v10 = vsel %vm1441_vm4, %v1627_v6, 0 }
 0x2fd   : > { %v2217_v13 = vpop.f32.mrf.mxu0  ;;  %v2223_v14 = vpop.f32.mrf.mxu1  ;;  %v1382_v15 = vsel %vm1175_vm3, %v1378_v11, -inf  ;;  %v1385_v22 = vsel %vm1175_vm3, %v1379_v12, -inf }
 0x2fe   : > { %1383 = vmax.xlane.f32.xlu1 %v1382_v15  ;;  %v1629_v14 = vld [vmem:[%s2996_s8 + $0x8] sm:$0xf] }
 0x2ff   : > { %v1308_v16 = vpop.f32.mrf.mxu0  ;;  %v1354_v17 = vpop.f32.mrf.mxu1 }
 0x300   : > { %v1364_v18 = vmul.f32 0.35355338, %v1308_v16  ;;  %v1365_v19 = vmul.f32 0.35355338, %v1354_v17  ;;  %v1727_v17 = vsel %vm1441_vm4, %v1629_v14, 0 }
 0x301   : > { %v2228_v20 = vpop.f32.mrf.mxu0  ;;  %v2234_v21 = vpop.f32.mrf.mxu1 }
 0x302   : > { %v1374_v23 = vsel %vm1371_vm6, -1e+09, %v1364_v18  ;;  %v1375_v24 = vsel %vm1371_vm6, -1e+09, %v1365_v19  ;;  %1386 = vmax.xlane.f32.xlu1 %v1385_v22  ;;  %v1630_v19 = vld [vmem:[%s2996_s8 + $0xc] sm:$0xf] }
 0x303   : > { %v1311_v25 = vpop.f32.mrf.mxu0  ;;  %v1357_v26 = vpop.f32.mrf.mxu1  ;;  %v1381_v27 = vmul.f32 %v1377_v63, %v1375_v24  ;;  %v1380_v28 = vmul.f32 %v1377_v63, %v1374_v23  ;;  %v1773_v23 = vsel %vm1441_vm4, %v1630_v19, 0 }
 0x305   : > { %v2229_v29 = vpop.f32.mrf.mxu0  ;;  %v2235_v30 = vpop.f32.mrf.mxu1  ;;  %v1391_v31 = vsel %vm1175_vm3, %v1381_v27, -inf  ;;  %v1388_v32 = vsel %vm1175_vm3, %v1380_v28, -inf }
 0x306   : > { %1392 = vmax.xlane.f32.xlu1 %v1391_v31  ;;  %1389 = vmax.xlane.f32.xlu0 %v1388_v32 }
 0x387   : > { %v1384_v33 = vpop.xlane.xlu1 %1383 }
 0x388   : > { %v1394_v34 = vsub.f32 %v1378_v11, %v1384_v33 }
 0x38a   : > { %v1398_v35 = vmul.f32 1.442695, %v1394_v34 }
 0x38b   : > { %v1387_v36 = vpop.xlane.xlu1 %1386 }
 0x38c   : > { %2375 = vpow2.f32 %v1398_v35  ;;  %v1395_v37 = vsub.f32 %v1379_v12, %v1387_v36  ;;  %v1628_v12 = vld [vmem:[%s2996_s8 + $0x4] sm:$0xf] }
 0x38d   : > { %v1681_v13 = vsel %vm1441_vm4, %v1628_v12, 0 }
 0x38e   : > { %v1400_v38 = vmul.f32 1.442695, %v1395_v37 }
 0x38f   : > { %v1393_v39 = vpop.xlane.xlu1 %1392  ;;  %v1390_v40 = vpop.xlane.xlu0 %1389 }
 0x390   : > { %2377 = vpow2.f32 %v1400_v38  ;;  %v1397_v41 = vsub.f32 %v1381_v27, %v1393_v39  ;;  %v1396_v42 = vsub.f32 %v1380_v28, %v1390_v40 }
 0x392   : > { %v1404_v43 = vmul.f32 1.442695, %v1397_v41  ;;  %v1402_v44 = vmul.f32 1.442695, %v1396_v42 }
 0x394   : > { %2379 = vpow2.f32 %v1404_v43 }
 0x395   : > { %2381 = vpow2.f32 %v1402_v44 }
 0x399   : > { %v2376_v45 = vpop.eup %2375 }
 0x39a   : > { %v1406_v46 = vsel %vm1175_vm3, %v2376_v45, 0.0 }
 0x39b   : > { %1407 = vadd.xlane.f32.xlu0 %v1406_v46 }
 0x39d   : > { %v2378_v47 = vpop.eup %2377 }
 0x39e   : > { %v1409_v48 = vsel %vm1175_vm3, %v2378_v47, 0.0 }
 0x39f   : > { %1410 = vadd.xlane.f32.xlu1 %v1409_v48 }
 0x3a1   : > { %v2380_v49 = vpop.eup %2379 }
 0x3a2   : > { %v2382_v50 = vpop.eup %2381  ;;  %v1415_v51 = vsel %vm1175_vm3, %v2380_v49, 0.0 }
 0x3a3   : > { %1416 = vadd.xlane.f32.xlu1 %v1415_v51  ;;  %v1412_v52 = vsel %vm1175_vm3, %v2382_v50, 0.0 }
 0x3a4   : > { %1413 = vadd.xlane.f32.xlu0 %v1412_v52 }
 0x424   : > { %v1408_v53 = vpop.xlane.xlu0 %1407 }
 0x425   : > { %2383 = vrcp.f32 %v1408_v53 }
 0x428   : > { %v1411_v54 = vpop.xlane.xlu1 %1410 }
 0x429   : > { %2385 = vrcp.f32 %v1411_v54 }
 0x42c   : > { %v1417_v55 = vpop.xlane.xlu1 %1416 }
 0x42d   : > { %2387 = vrcp.f32 %v1417_v55  ;;  %v1414_v56 = vpop.xlane.xlu0 %1413 }
 0x42e   : > { %2389 = vrcp.f32 %v1414_v56 }
 0x432   : > { %v2384_v57 = vpop.eup %2383 }
 0x433   : > { %v1422_v58 = vmul.f32 %v2384_v57, %v2376_v45 }
 0x435   : > { %v1430_v60 = vpack.c.bf16 %v1422_v58, %v1422_v58  ;;  %1426 = vst.msk [vmem:[%s2847_s20] sm:$0xff] %vm1175_vm3, %v1422_v58 }
 0x436   : > { %v2386_v61 = vpop.eup %2385 }
 0x437   : > { %2239 = vmatmul.mubr.msk.bf16.vlgmr.msra.gmra.mxu0 %vm1175_vm3, %v1430_v60  ;;  %v1423_v63 = vmul.f32 %v2386_v61, %v2378_v47 }
 0x438   : > { %2249 = vmatpush3.bf16.msra.mxu0 %v1535_v62  ;;  %2250 = vmatprep.mubr.msk.bf16.mxu0 %vm2500_vm1, %v2499_v9 }
 0x439   : > { %v1431_v1 = vpack.c.bf16 %v1423_v63, %v1423_v63  ;;  %2260 = vmatprep.subr.bf16.mxu0 %v2499_v9  ;;  %1427 = vst.msk [vmem:[%s2847_s20 + $0x8] sm:$0xff] %vm1175_vm3, %v1423_v63 }
 0x43a   : > { %v2388_v2 = vpop.eup %2387 }
 0x43b   : > { %v2390_v3 = vpop.eup %2389  ;;  %v1425_v4 = vmul.f32 %v2388_v2, %v2380_v49  ;;  %2245 = vmatmul.mubr.msk.bf16.vlgmr.msra.gmra.mxu1 %vm1175_vm3, %v1431_v1 }
 0x43c   : > { %v1424_v7 = vmul.f32 %v2390_v3, %v2382_v50  ;;  %2255 = vmatpush3.bf16.msra.mxu1 %v1581_v5  ;;  %2256 = vmatprep.mubr.msk.bf16.mxu1 %vm2500_vm1, %v2499_v9 }
 0x43d   : > { %2266 = vmatprep.subr.bf16.mxu1 %v2499_v9  ;;  %1429 = vst.msk [vmem:[%s2847_s20 + $0x18] sm:$0xff] %vm1175_vm3, %v1425_v4  ;;  %v1433_v11 = vpack.c.bf16 %v1425_v4, %v1425_v4 }
 0x43e   : > { %v1432_v8 = vpack.c.bf16 %v1424_v7, %v1424_v7  ;;  %1428 = vst.msk [vmem:[%s2847_s20 + $0x10] sm:$0xff] %vm1175_vm3, %v1424_v7  ;;  %s2397_s20 = scalar_lea.vmem %s2396_s0, 1024 }
 0x43f   : > { %p2399_p2 = scmp.lt.s32.totalorder %s2397_s20, %s2391_s19 }
 0x440   : > { %2251 = vmatmul.mubr.msk.bf16.vlgmr.msra.gmra.mxu0 %vm1175_vm3, %v1432_v8 }
 0x441   : > { %2261 = vmatpush3.bf16.msra.mxu0 %v1635_v10  ;;  %2262 = vmatprep.mubr.msk.bf16.mxu0 %vm2500_vm1, %v2499_v9  ;;  %p2400_p3 = por %p2399_p2, %p2398_p1 }
 0x442   : > { %2272 = vmatprep.subr.bf16.mxu0 %v2499_v9 }
 0x443   : > { %2257 = vmatmul.mubr.msk.bf16.vlgmr.msra.gmra.mxu1 %vm1175_vm3, %v1433_v11  ;;  %p2401_p5 = pnand %p2400_p3, %p2394_p0 }
 0x444   : > { %2268 = vmatprep.mubr.msk.bf16.mxu1 %vm2500_vm1, %v2499_v9  ;;  %2267 = vmatpush3.bf16.msra.mxu1 %v1681_v13 }
 0x445   : > { %2278 = vmatprep.subr.bf16.mxu1 %v2499_v9 }
 0x4f7   : > { %v1479_v15 = vpop.f32.mrf.mxu0 }
 0x4f8   : > { %v1623_v16 = vpack.c.bf16 %v1479_v15, %v1479_v15 }
 0x4f9   : > { %v2240_v18 = vpop.f32.mrf.mxu0 }
 0x4fa   : > { %2263 = vmatmul.mubr.msk.bf16.vlgmr.msra.gmra.mxu0 %vm1175_vm3, %v1623_v16 }
 0x4fb   : > { %v1482_v20 = vpop.f32.mrf.mxu0  ;;  %v1525_v21 = vpop.f32.mrf.mxu1  ;;  %2273 = vmatpush3.bf16.msra.mxu0 %v1727_v17  ;;  %2274 = vmatprep.mubr.msk.bf16.mxu0 %vm2500_vm1, %v2499_v9 }
 0x4fc   : > { %v1624_v22 = vpack.c.bf16 %v1525_v21, %v1525_v21 }
 0x4fd   : > { %v2241_v24 = vpop.f32.mrf.mxu0  ;;  %v2246_v25 = vpop.f32.mrf.mxu1 }
 0x4fe   : > { %2269 = vmatmul.mubr.msk.bf16.vlgmr.msra.gmra.mxu1 %vm1175_vm3, %v1624_v22 }
 0x4ff   : > { %v1528_v26 = vpop.f32.mrf.mxu1  ;;  %2279 = vmatpush3.bf16.msra.mxu1 %v1773_v23  ;;  %2280 = vmatprep.mubr.msk.bf16.mxu1 %vm2500_vm1, %v2499_v9 }
 0x500   : > { %v1571_v27 = vpop.f32.mrf.mxu0 }
 0x501   : > { %v1625_v28 = vpack.c.bf16 %v1571_v27, %v1571_v27  ;;  %v2247_v29 = vpop.f32.mrf.mxu1 }
 0x502   : > { %v2252_v30 = vpop.f32.mrf.mxu0 }
 0x503   : > { %2275 = vmatmul.mubr.msk.bf16.vlgmr.msra.gmra.mxu0 %vm1175_vm3, %v1625_v28  ;;  %v1617_v31 = vpop.f32.mrf.mxu1 }
 0x504   : > { %v1574_v32 = vpop.f32.mrf.mxu0  ;;  %v1626_v33 = vpack.c.bf16 %v1617_v31, %v1617_v31 }
 0x505   : > { %v2258_v34 = vpop.f32.mrf.mxu1 }
 0x506   : > { %v2253_v35 = vpop.f32.mrf.mxu0  ;;  %2281 = vmatmul.mubr.msk.bf16.vlgmr.msra.gmra.mxu1 %vm1175_vm3, %v1626_v33 }
 0x507   : > { %v1620_v36 = vpop.f32.mrf.mxu1 }
 0x509   : > { %v2259_v37 = vpop.f32.mrf.mxu1 }
 0x50a   : > { %2404 = shalt.err (!%p2401_p5)
}
 0x50b   : > { %s2405_s24 = scalar_lea.hbm %s2906_s11, 512  ;;  %s2409_s28 = scalar_lea.hbm %s2998_s10, 1024 }
 0x50c   : > { %p2406_p6 = scmp.ne.s32.totalorder %s2906_s11, %s2405_s24  ;;  %p2410_p10 = scmp.lt.s32.totalorder %s2906_s11, %s2998_s10 }
 0x50d   : > { %p2411_p11 = scmp.lt.s32.totalorder %s2409_s28, %s2405_s24 }
 0x50e   : > { %p2407_p7 = pnand %p2406_p6, %p2601_p4 }
 0x50f   : > { %p2412_p12 = por %p2411_p11, %p2410_p10 }
 0x510   : > { %p2408_p9 = pneg %p2407_p7 }
 0x512   : > { %p2413_p13 = pnand %p2412_p12, %p2408_p9 }
 0x514   : > { %2416 = shalt.err (!%p2413_p13)
}
 0x515   : > { %s2503_s0 = smov 128   ;;  %s2504_s19 = smov 8  }
 0x516   : > { %s3005_s20 = scalar_lea.sflag [#allocation8], %s2844_s27  ;;  %s1994_s1 = sshll.u32 %s2844_s27, 3 }
 0x517   : > { %2285 = dma.vmem_to_hbm [thread:$0]  (%p2601_p4), %s2901_s22, 512, %s2906_s11, %s3005_s20, %s2503_s0, %s2503_s0, %s2504_s19  }
 0x518   : > { %s2050_s22 = sshll.u32 %s2489_s16, 7  ;;  %s402_s11 = scalar_lea.vmem [#allocation5], %s1994_s1 }
 0x519   : > { %s1844_s12 = sshll.u32 %s402_s11, 4  ;;  %s2940_s30 = scalar_lea.hbm %s2997_s9, %s2050_s22  ;;  %s2942_s12 = int_to_ptr.vmem [resolvable:$true] %s1844_s12 }
 0x51a   : > { %s1825_s16 = scalar_lea.sflag [#allocation6], %s2844_s27  ;;  %s2417_s28 = scalar_lea.vmem %s2942_s12, 128 }
 0x51b   : > { %p2418_p0 = scmp.ne.s32.totalorder %s2942_s12, %s2417_s28  ;;  %s2505_s0 = smov [#allocation5]  }
 0x51c   : > { %s2421_s19 = sshll.u32 %s2505_s0, 4  ;;  %s2422_s19 = int_to_ptr.vmem [resolvable:$false] %s2421_s19 }
 0x51d   : > { %p2419_p1 = pnand %p2418_p0, %p2601_p4  ;;  %s2423_s20 = scalar_lea.vmem %s2422_s19, 256 }
 0x51e   : > { %p2424_p3 = scmp.lt.s32.totalorder %s2942_s12, %s2422_s19  ;;  %p2425_p5 = scmp.lt.s32.totalorder %s2423_s20, %s2417_s28 }
 0x51f   : > { %p2420_p2 = pneg %p2419_p1 }
 0x520   : > { %p2426_p6 = por %p2425_p5, %p2424_p3 }
 0x522   : > { %p2427_p7 = pnand %p2426_p6, %p2420_p2 }
 0x5ba   : > { %v1671_v9 = vpop.f32.mrf.mxu0 }
 0x5bb   : > { %v1816_v45 = vsel %vm430_vm0, %v1671_v9, 0.0 }
 0x5bc   : > { %v2264_v38 = vpop.f32.mrf.mxu0 }
 0x5be   : > { %v1674_v39 = vpop.f32.mrf.mxu0  ;;  %v1717_v40 = vpop.f32.mrf.mxu1 }
 0x5bf   : > { %v1817_v43 = vsel %vm430_vm0, %v1717_v40, 0.0 }
 0x5c0   : > { %v2265_v41 = vpop.f32.mrf.mxu0  ;;  %v2270_v42 = vpop.f32.mrf.mxu1  ;;  %v1818_v47 = vadd.f32 %v1817_v43, %v1816_v45 }
 0x5c2   : > { %v1720_v44 = vpop.f32.mrf.mxu1 }
 0x5c3   : > { %v1763_v46 = vpop.f32.mrf.mxu0 }
 0x5c4   : > { %v1819_v48 = vsel %vm430_vm0, %v1763_v46, 0.0  ;;  %v2271_v49 = vpop.f32.mrf.mxu1 }
 0x5c5   : > { %v2276_v50 = vpop.f32.mrf.mxu0  ;;  %v1820_v51 = vadd.f32 %v1819_v48, %v1818_v47 }
 0x5c6   : > { %v1809_v52 = vpop.f32.mrf.mxu1 }
 0x5c7   : > { %v1766_v53 = vpop.f32.mrf.mxu0  ;;  %v1821_v54 = vsel %vm430_vm0, %v1809_v52, 0.0 }
 0x5c8   : > { %v1822_v55 = vadd.f32 %v1821_v54, %v1820_v51  ;;  %v2282_v56 = vpop.f32.mrf.mxu1 }
 0x5c9   : > { %v2277_v57 = vpop.f32.mrf.mxu0 }
 0x5ca   : > { %v1812_v58 = vpop.f32.mrf.mxu1  ;;  %1823 = vst.msk [vmem:[%s402_s11] sm:$0xff] %vm430_vm0, %v1822_v55 }
 0x5cb   : > { %2430 = shalt.err (!%p2427_p7)
}
 0x5cc   : > { %s2431_s1 = scalar_lea.hbm %s2940_s30, 128  ;;  %s2435_s11 = scalar_lea.hbm %s2997_s9, 256 }
 0x5cd   : > { %p2432_p9 = scmp.ne.s32.totalorder %s2940_s30, %s2431_s1  ;;  %p2436_p12 = scmp.lt.s32.totalorder %s2940_s30, %s2997_s9 }
 0x5ce   : > { %p2437_p13 = scmp.lt.s32.totalorder %s2435_s11, %s2431_s1 }
 0x5cf   : > { %p2433_p10 = pnand %p2432_p9, %p2601_p4 }
 0x5d0   : > { %p2438_p0 = por %p2437_p13, %p2436_p12 }
 0x5d1   : > { %p2434_p11 = pneg %p2433_p10 }
 0x5d3   : > { %p2439_p1 = pnand %p2438_p0, %p2434_p11 }
 0x5d5   : > { %2442 = shalt.err (!%p2439_p1)
}
 0x5d6   : > { %2284 = dma.vmem_to_hbm [thread:$0]  (%p2601_p4), %s2942_s12, 128, %s2940_s30, %s1825_s16   ;;  %v2283_v59 = vpop.f32.mrf.mxu1 }
 0x5d7 PF: > { %p2295_p2 = scmp.ge.s32.totalorder %s2497_s18, 2  ;;  %s1873_s28 = sand.u32 1, %s2477_s13  }
 0x5d8   : > { %s1874_s0 = scalar_lea.sflag [#allocation6], %s1873_s28 }
 0x5d9   : > { %p2289_p3 = pnand %p2295_p2, %p2608_p8 }
 0x5db   : > { %p2290_p5 = pneg %p2289_p3 }
 0x5dd   : > { %2468 = dma.done.wait (%p2290_p5), %s1874_s0, 128  }
 0x5de   : > { %2470 = vsyncadd (%p2290_p5), %s1874_s0, 4294967168  ;;  %s1883_s19 = scalar_lea.sflag [#allocation8], %s1873_s28 }
 0x5df   : > { %2472 = dma.done.wait (%p2290_p5), %s1883_s19, 512  }
 0x5e0   : > { %2474 = vsyncadd (%p2290_p5), %s1883_s19, 4294966784  ;;  %s27_s18 = sadd.s32 1, %s2497_s18   ;;  %s3006_s13 = smov %s2481_s14 }
 0x5e1   : > { %p24_p6 = scmp.ge.s32.totalorder %s27_s18, 4   ;;  %s3007_s14 = smov %s2485_s15 }
 0x5e2   : > { %s3008_s15 = smov %s2614_s26  ;;  %s3009_s16 = smov %s2493_s17 }
 0x5e3   : > { %s3010_s17 = smov %s3012_s21  ;;  %26 = sbr.rel (!%p24_p6) target bundleno = 9 (0x9), region = 119 }
 0x5e8   :  { %1888 = vsyncpa [#allocation6], 1 }
 0x5e9   :  { %1890 = vsyncpa [#allocation6 + $0x1], 1 }
 0x5ea   :  { %1891 = vsyncpa [#allocation8], 1 }
 0x5eb   :  { %1893 = vsyncpa [#allocation8 + $0x1], 1 }

</bundles_post_ra>
